<compile_context>
chip_gen: v5e
topology: v5e:2x2
jax: 0.10.0
libtpu: 0.0.40
codegen_flags: <defaults>
</compile_context>

<pallas_src>
import jax
import jax.numpy as jnp
import numpy as np
from jax.experimental import pallas as pl
from jax.experimental.pallas import tpu as pltpu

INPUT_DIM = 33   # state features
OUTPUT_DIM = 7   # action features
HIDDEN = 64


def _round_up(x, m):
    return (x + m - 1) // m * m


def _disc_kernel(s_ref, a_ref, w1s_ref, w1a_ref, b1_ref, w2_ref, b2_ref,
                 w3_ref, b3_ref, o_ref):
    # fc1: two MXU matmuls replace cat([state, action], -1) @ W1.
    h1 = jnp.dot(s_ref[...], w1s_ref[...], preferred_element_type=jnp.float32)
    h1 = h1 + jnp.dot(a_ref[...], w1a_ref[...],
                      preferred_element_type=jnp.float32)
    h1 = jnp.maximum(h1 + b1_ref[...], 0.0)                   # (TILE_B, 64) f32

    # fc2 (bias + ReLU in f32; matmul operands in the streaming dtype).
    h2 = jnp.dot(h1.astype(w2_ref.dtype), w2_ref[...],
                 preferred_element_type=jnp.float32)
    h2 = jnp.maximum(h2 + b2_ref[...], 0.0)                   # (TILE_B, 64) f32

    # fc3 (single output unit): VPU mul + cross-lane reduce (XLU slot is free
    # here), avoiding an MXU pass that would use 1 of 128/256 result columns.
    logits = jnp.sum(h2 * w3_ref[...], axis=-1, keepdims=True) + b3_ref[...]
    o_ref[...] = jax.nn.sigmoid(logits).astype(o_ref.dtype)   # (TILE_B, 1)


def discriminator_forward(state, action, params, *, tile_b=256,
                          compute_dtype=jnp.bfloat16):
    """state: (B, 33), action: (B, 7) -> (B, 1) probabilities (f32)."""
    w1s, w1a, b1, w2, b2, w3, b3 = params
    B = state.shape[0]

    # Batch tile: multiple of 16 sublanes (covers f32 and bf16 native tiling),
    # capped so tiny batches use a single small tile.  256 keeps vreg pressure
    # and the (tile_b, 1)-block output buffer modest while amortizing the
    # ~0.35 us per-grid-step overhead.
    tile_b = _round_up(min(tile_b, _round_up(B, 16)), 16)
    steps = pl.cdiv(B, tile_b)
    b_pad = steps * tile_b

    s = state.astype(compute_dtype)
    a = action.astype(compute_dtype)
    if b_pad != B:   # pad last partial tile with zero rows; sliced off below
        s = jnp.pad(s, ((0, b_pad - B), (0, 0)))
        a = jnp.pad(a, ((0, b_pad - B), (0, 0)))

    # Matmul weights stream in compute_dtype; everything touched on the VPU
    # (biases, fc3 weight) stays f32.
    w1s = w1s.astype(compute_dtype)
    w1a = w1a.astype(compute_dtype)
    w2 = w2.astype(compute_dtype)
    b1 = b1.astype(jnp.float32)
    b2 = b2.astype(jnp.float32)
    w3 = w3.astype(jnp.float32)
    b3 = b3.astype(jnp.float32)

    batch_spec = lambda cols: pl.BlockSpec((tile_b, cols), lambda i: (i, 0))
    const_spec = lambda shape: pl.BlockSpec(shape, lambda i: (0, 0))

    out = pl.pallas_call(
        _disc_kernel,
        grid=(steps,),
        in_specs=[
            batch_spec(INPUT_DIM),             # state tile   (streamed)
            batch_spec(OUTPUT_DIM),            # action tile  (streamed)
            const_spec((INPUT_DIM, HIDDEN)),   # W1[:33]      (resident)
            const_spec((OUTPUT_DIM, HIDDEN)),  # W1[33:]      (resident)
            const_spec((1, HIDDEN)),           # b1           (resident)
            const_spec((HIDDEN, HIDDEN)),      # W2           (resident)
            const_spec((1, HIDDEN)),           # b2           (resident)
            const_spec((1, HIDDEN)),           # W3 as a row  (resident, f32)
            const_spec((1, 1)),                # b3           (resident, f32)
        ],
        out_specs=pl.BlockSpec((tile_b, 1), lambda i: (i, 0)),
        out_shape=jax.ShapeDtypeStruct((b_pad, 1), jnp.float32),
        compiler_params=pltpu.CompilerParams(
            dimension_semantics=("parallel",)),
    )(s, a, w1s, w1a, b1, w2, b2, w3, b3)

    return out[:B]


def init_params(key):
    """PyTorch nn.Linear default init (U[-1/sqrt(fan_in), 1/sqrt(fan_in)]),
    stored in kernel-native layout: W as (in, out), fc1 split state/action,
    W3 as a (1, 64) row."""
    def linear(k, fan_in, fan_out):
        kw, kb = jax.random.split(k)
        bound = 1.0 / np.sqrt(fan_in)
        w = jax.random.uniform(kw, (fan_in, fan_out), jnp.float32, -bound, bound)
        b = jax.random.uniform(kb, (1, fan_out), jnp.float32, -bound, bound)
        return w, b

    k1, k2, k3 = jax.random.split(key, 3)
    w1, b1 = linear(k1, INPUT_DIM + OUTPUT_DIM, HIDDEN)
    w2, b2 = linear(k2, HIDDEN, HIDDEN)
    w3c, b3 = linear(k3, HIDDEN, 1)                  # (64, 1)
    return (w1[:INPUT_DIM], w1[INPUT_DIM:], b1, w2, b2, w3c.T, b3)


def reference_forward(state, action, params):
    """Pure-JAX f32 reference matching the PyTorch module."""
    w1s, w1a, b1, w2, b2, w3, b3 = params
    x = jnp.concatenate([state, action], axis=-1)
    w1 = jnp.concatenate([w1s, w1a], axis=0)
    h1 = jnp.maximum(x @ w1 + b1, 0.0)
    h2 = jnp.maximum(h1 @ w2 + b2, 0.0)
    return jax.nn.sigmoid(h2 @ w3.T + b3)


if __name__ == "__main__":
    key = jax.random.PRNGKey(0)
    kp, ks, ka, ks2, ka2 = jax.random.split(key, 5)
    params = init_params(kp)

    # Test 1: tiny, non-multiple-of-8 batch; f32 streaming -> tight tolerance.
    B = 5
    state = jax.random.normal(ks, (B, INPUT_DIM), jnp.float32)
    action = jax.random.normal(ka, (B, OUTPUT_DIM), jnp.float32)
    out = jax.block_until_ready(
        discriminator_forward(state, action, params, compute_dtype=jnp.float32))
    ref = reference_forward(state, action, params)
    np.testing.assert_allclose(np.asarray(out), np.asarray(ref),
                               rtol=1e-5, atol=1e-6)
    assert out.shape == (B, 1)

    # Test 2: multi-step grid + padded last tile + bf16 streaming path.
    B2 = 300
    state2 = jax.random.normal(ks2, (B2, INPUT_DIM), jnp.float32)
    action2 = jax.random.normal(ka2, (B2, OUTPUT_DIM), jnp.float32)
    out2 = jax.block_until_ready(
        discriminator_forward(state2, action2, params, tile_b=128,
                              compute_dtype=jnp.bfloat16))
    ref2 = reference_forward(state2, action2, params)
    np.testing.assert_allclose(np.asarray(out2), np.asarray(ref2),
                               rtol=5e-2, atol=1e-2)
    assert out2.shape == (B2, 1)

    print("KERNEL_OK")
</pallas_src>

<mosaic_0001>
module attributes {stable_mosaic.version = 11 : i64} {
  func.func @_disc_kernel(%arg0: i32, %arg1: memref<16x33xf32, #tpu.memory_space<vmem>>, %arg2: memref<16x7xf32, #tpu.memory_space<vmem>>, %arg3: memref<33x64xf32, #tpu.memory_space<vmem>>, %arg4: memref<7x64xf32, #tpu.memory_space<vmem>>, %arg5: memref<1x64xf32, #tpu.memory_space<vmem>>, %arg6: memref<64x64xf32, #tpu.memory_space<vmem>>, %arg7: memref<1x64xf32, #tpu.memory_space<vmem>>, %arg8: memref<1x64xf32, #tpu.memory_space<vmem>>, %arg9: memref<1x1xf32, #tpu.memory_space<vmem>>, %arg10: memref<16x1xf32, #tpu.memory_space<vmem>>) attributes {dimension_semantics = [#tpu.dimension_semantics<parallel>], iteration_bounds = array<i64: 1>, scalar_prefetch = 0 : i64, scratch_operands = 0 : i64, tpu.core_type = #tpu.core_type<tc>, window_params = [{transform_indices = @transform_0, window_bounds = array<i64: 16, 33>}, {transform_indices = @transform_1, window_bounds = array<i64: 16, 7>}, {pipeline_mode = #tpu.pipeline_mode<synchronous>, transform_indices = @transform_2, window_bounds = array<i64: 33, 64>}, {pipeline_mode = #tpu.pipeline_mode<synchronous>, transform_indices = @transform_3, window_bounds = array<i64: 7, 64>}, {pipeline_mode = #tpu.pipeline_mode<synchronous>, transform_indices = @transform_4, window_bounds = array<i64: 1, 64>}, {pipeline_mode = #tpu.pipeline_mode<synchronous>, transform_indices = @transform_5, window_bounds = array<i64: 64, 64>}, {pipeline_mode = #tpu.pipeline_mode<synchronous>, transform_indices = @transform_6, window_bounds = array<i64: 1, 64>}, {pipeline_mode = #tpu.pipeline_mode<synchronous>, transform_indices = @transform_7, window_bounds = array<i64: 1, 64>}, {pipeline_mode = #tpu.pipeline_mode<synchronous>, transform_indices = @transform_8, window_bounds = array<i64: 1, 1>}, {transform_indices = @transform_9, window_bounds = array<i64: 16, 1>}]} {
    %c0 = arith.constant 0 : index
    %c0_0 = arith.constant 0 : index
    %0 = vector.load %arg1[%c0, %c0_0] : memref<16x33xf32, #tpu.memory_space<vmem>>, vector<16x33xf32>
    %c0_1 = arith.constant 0 : index
    %c0_2 = arith.constant 0 : index
    %1 = vector.load %arg3[%c0_1, %c0_2] : memref<33x64xf32, #tpu.memory_space<vmem>>, vector<33x64xf32>
    %cst = arith.constant dense<0.000000e+00> : vector<16x64xf32>
    %2 = tpu.matmul %0, %1, %cst {dimension_numbers = #tpu.dot_dimension_numbers<[1], [0], [0], [1], [0, 0, 1, 1], [], []>} : vector<16x33xf32>, vector<33x64xf32>, vector<16x64xf32> -> vector<16x64xf32>
    %c0_3 = arith.constant 0 : index
    %c0_4 = arith.constant 0 : index
    %3 = vector.load %arg2[%c0_3, %c0_4] : memref<16x7xf32, #tpu.memory_space<vmem>>, vector<16x7xf32>
    %c0_5 = arith.constant 0 : index
    %c0_6 = arith.constant 0 : index
    %4 = vector.load %arg4[%c0_5, %c0_6] : memref<7x64xf32, #tpu.memory_space<vmem>>, vector<7x64xf32>
    %cst_7 = arith.constant dense<0.000000e+00> : vector<16x64xf32>
    %5 = tpu.matmul %3, %4, %cst_7 {dimension_numbers = #tpu.dot_dimension_numbers<[1], [0], [0], [1], [0, 0, 1, 1], [], []>} : vector<16x7xf32>, vector<7x64xf32>, vector<16x64xf32> -> vector<16x64xf32>
    %6 = arith.addf %2, %5 : vector<16x64xf32>
    %c0_8 = arith.constant 0 : index
    %c0_9 = arith.constant 0 : index
    %7 = vector.load %arg5[%c0_8, %c0_9] : memref<1x64xf32, #tpu.memory_space<vmem>>, vector<1x64xf32>
    %8 = vector.broadcast %7 : vector<1x64xf32> to vector<16x64xf32>
    %9 = arith.addf %6, %8 : vector<16x64xf32>
    %cst_10 = arith.constant 0.000000e+00 : f32
    %10 = vector.broadcast %cst_10 : f32 to vector<16x64xf32>
    %11 = arith.maximumf %9, %10 : vector<16x64xf32>
    %c0_11 = arith.constant 0 : index
    %c0_12 = arith.constant 0 : index
    %12 = vector.load %arg6[%c0_11, %c0_12] : memref<64x64xf32, #tpu.memory_space<vmem>>, vector<64x64xf32>
    %cst_13 = arith.constant dense<0.000000e+00> : vector<16x64xf32>
    %13 = tpu.matmul %11, %12, %cst_13 {dimension_numbers = #tpu.dot_dimension_numbers<[1], [0], [0], [1], [0, 0, 1, 1], [], []>} : vector<16x64xf32>, vector<64x64xf32>, vector<16x64xf32> -> vector<16x64xf32>
    %c0_14 = arith.constant 0 : index
    %c0_15 = arith.constant 0 : index
    %14 = vector.load %arg7[%c0_14, %c0_15] : memref<1x64xf32, #tpu.memory_space<vmem>>, vector<1x64xf32>
    %15 = vector.broadcast %14 : vector<1x64xf32> to vector<16x64xf32>
    %16 = arith.addf %13, %15 : vector<16x64xf32>
    %cst_16 = arith.constant 0.000000e+00 : f32
    %17 = vector.broadcast %cst_16 : f32 to vector<16x64xf32>
    %18 = arith.maximumf %16, %17 : vector<16x64xf32>
    %c0_17 = arith.constant 0 : index
    %c0_18 = arith.constant 0 : index
    %19 = vector.load %arg8[%c0_17, %c0_18] : memref<1x64xf32, #tpu.memory_space<vmem>>, vector<1x64xf32>
    %20 = vector.broadcast %19 : vector<1x64xf32> to vector<16x64xf32>
    %21 = arith.mulf %18, %20 : vector<16x64xf32>
    %cst_19 = arith.constant dense<0.000000e+00> : vector<16xf32>
    %22 = vector.multi_reduction <add>, %21, %cst_19 [1] : vector<16x64xf32> to vector<16xf32>
    %23 = vector.shape_cast %22 : vector<16xf32> to vector<16x1xf32>
    %c0_20 = arith.constant 0 : index
    %c0_21 = arith.constant 0 : index
    %24 = vector.load %arg9[%c0_20, %c0_21] : memref<1x1xf32, #tpu.memory_space<vmem>>, vector<1x1xf32>
    %25 = vector.broadcast %24 : vector<1x1xf32> to vector<16x1xf32>
    %26 = arith.addf %23, %25 : vector<16x1xf32>
    %27 = arith.negf %26 : vector<16x1xf32>
    %28 = math.exp %27 : vector<16x1xf32>
    %cst_22 = arith.constant 1.000000e+00 : f32
    %29 = vector.broadcast %cst_22 : f32 to vector<16x1xf32>
    %30 = arith.addf %29, %28 : vector<16x1xf32>
    %31 = arith.divf %29, %30 : vector<16x1xf32>
    %c0_23 = arith.constant 0 : index
    %c0_24 = arith.constant 0 : index
    %32 = vector.load %arg10[%c0_23, %c0_24] : memref<16x1xf32, #tpu.memory_space<vmem>>, vector<16x1xf32>
    tpu.vector_store %arg10[%c0_23, %c0_24], %31 {strides = array<i32>} : memref<16x1xf32, #tpu.memory_space<vmem>>, vector<16x1xf32>,
    return
  }
  func.func @transform_0(%arg0: i32) -> (i32, i32) {
    %c0_i32 = arith.constant 0 : i32
    %c0_i32_0 = arith.constant 0 : i32
    return %arg0, %c0_i32 : i32, i32
  }
  func.func @transform_1(%arg0: i32) -> (i32, i32) {
    %c0_i32 = arith.constant 0 : i32
    %c0_i32_0 = arith.constant 0 : i32
    return %arg0, %c0_i32 : i32, i32
  }
  func.func @transform_2(%arg0: i32) -> (i32, i32) {
    %c0_i32 = arith.constant 0 : i32
    %c0_i32_0 = arith.constant 0 : i32
    %c0_i32_1 = arith.constant 0 : i32
    return %c0_i32, %c0_i32_0 : i32, i32
  }
  func.func @transform_3(%arg0: i32) -> (i32, i32) {
    %c0_i32 = arith.constant 0 : i32
    %c0_i32_0 = arith.constant 0 : i32
    %c0_i32_1 = arith.constant 0 : i32
    return %c0_i32, %c0_i32_0 : i32, i32
  }
  func.func @transform_4(%arg0: i32) -> (i32, i32) {
    %c0_i32 = arith.constant 0 : i32
    %c0_i32_0 = arith.constant 0 : i32
    %c0_i32_1 = arith.constant 0 : i32
    return %c0_i32, %c0_i32_0 : i32, i32
  }
  func.func @transform_5(%arg0: i32) -> (i32, i32) {
    %c0_i32 = arith.constant 0 : i32
    %c0_i32_0 = arith.constant 0 : i32
    %c0_i32_1 = arith.constant 0 : i32
    return %c0_i32, %c0_i32_0 : i32, i32
  }
  func.func @transform_6(%arg0: i32) -> (i32, i32) {
    %c0_i32 = arith.constant 0 : i32
    %c0_i32_0 = arith.constant 0 : i32
    %c0_i32_1 = arith.constant 0 : i32
    return %c0_i32, %c0_i32_0 : i32, i32
  }
  func.func @transform_7(%arg0: i32) -> (i32, i32) {
    %c0_i32 = arith.constant 0 : i32
    %c0_i32_0 = arith.constant 0 : i32
    %c0_i32_1 = arith.constant 0 : i32
    return %c0_i32, %c0_i32_0 : i32, i32
  }
  func.func @transform_8(%arg0: i32) -> (i32, i32) {
    %c0_i32 = arith.constant 0 : i32
    %c0_i32_0 = arith.constant 0 : i32
    %c0_i32_1 = arith.constant 0 : i32
    return %c0_i32, %c0_i32_0 : i32, i32
  }
  func.func @transform_9(%arg0: i32) -> (i32, i32) {
    %c0_i32 = arith.constant 0 : i32
    %c0_i32_0 = arith.constant 0 : i32
    return %arg0, %c0_i32 : i32, i32
  }
}

</mosaic_0001>

<bundles_post_ra>
// kernel: tpu_custom_call.1
= control target key start
LH: loop header
LB: loop body
LE: loop exit
PB: predicated region body
PF: predicated region fallthrough
CT: control target
= control target key end

     0   :  { %s448_s0 = inlined_call_operand.vmem [shape: f32[16,33], index: 0, kind: input, shape index: {}]   ;;  %s449_s1 = inlined_call_operand.vmem [shape: f32[16,7], index: 1, kind: input, shape index: {}]   ;;  %s450_s2 = inlined_call_operand.hbm [shape: f32[33,64], index: 2, kind: input, shape index: {}]   ;;  %s451_s3 = inlined_call_operand.vmem [shape: f32[7,64], index: 3, kind: input, shape index: {}]   ;;  %s452_s4 = inlined_call_operand.vmem [shape: f32[1,64], index: 4, kind: input, shape index: {}]   ;;  %s453_s5 = inlined_call_operand.hbm [shape: f32[64,64], index: 5, kind: input, shape index: {}]   ;;  %s454_s6 = inlined_call_operand.vmem [shape: f32[1,64], index: 6, kind: input, shape index: {}]   ;;  %s455_s7 = inlined_call_operand.vmem [shape: f32[1,64], index: 7, kind: input, shape index: {}]   ;;  %s456_s8 = inlined_call_operand.<no memory space> [shape: f32[1,1], index: 8, kind: input, shape index: {}]   ;;  %s457_s9 = inlined_call_operand.vmem [shape: f32[16,1], index: 9, kind: output, shape index: {}]  }
   0x1   :  { %v14_v0 = vstv %s456_s8 }
   0x2   :  { %15 = vst [vmem:[#allocation2] sm:$0x1] %v14_v0 }
   0x3   :  { %16 = vsyncpa [#allocation4], 0  ;;  %s26_s13 = sshll.u32 %s450_s2, 4  ;;  %s27_s13 = int_to_ptr.hbm [resolvable:$true] %s26_s13 }
   0x4   :  { %17 = vsyncpa [#allocation6], 0  ;;  %s347_s14 = smov [#allocation3]   ;;  %s43_s18 = sshll.u32 %s453_s5, 4  ;;  %s44_s18 = int_to_ptr.hbm [resolvable:$true] %s43_s18 }
   0x5   :  { %s28_s15 = sshll.u32 %s347_s14, 4  ;;  %s348_s19 = smov 128   ;;  %s29_s15 = int_to_ptr.vmem [resolvable:$true] %s28_s15 }
   0x6   :  { %s349_s20 = smov 8   ;;  %s350_s8 = smov [#allocation5]  }
   0x7   :  { %34 = dma.hbm_to_vmem [thread:$0]  %s27_s13, 640, %s29_s15, [#allocation4], %s348_s19, %s348_s19, %s349_s20  }
   0x8   :  { %s45_s21 = sshll.u32 %s350_s8, 4  ;;  %s46_s21 = int_to_ptr.vmem [resolvable:$true] %s45_s21 }
   0x9   :  { %51 = dma.hbm_to_vmem [thread:$0]  %s44_s18, 1024, %s46_s21, [#allocation6], %s348_s19, %s348_s19, %s349_s20  }
   0xa   :  { %343 = dma.done.wait [#allocation4], 640  }
   0xb   :  { %344 = vsyncadd [#allocation4], 4294966656 }
   0xc   :  { %345 = dma.done.wait [#allocation6], 1024  }
   0xd   :  { %346 = vsyncadd [#allocation6], 4294966272  ;;  %vm117_vm0 = vcmask 1040384   ;;  %vm83_vm1 = vcmask 1046528   ;;  %v72_v1 = vld [vmem:[#allocation3 + $0x20] sm:$0x1] }
   0xe   :  { %v71_v2 = vld [vmem:[#allocation3 + $0x18] sm:$0xff]  ;;  %vm76_vm2 = vcmask 56320   ;;  %264 = vmatpush.msk.msra.mxu1 %vm117_vm0, %v72_v1  ;;  %v70_v4 = vld [vmem:[#allocation3 + $0x10] sm:$0xff]  ;;  %v159_v6 = vld [vmem:[#allocation5 + $0x38] sm:$0xff]  ;;  %vm110_vm3 = vcmask 269312   ;;  %vm164_vm4 = vcmask 523264  }
   0xf   :  { %v75_v3 = vld [vmem:[%s451_s3] sm:$0x7f]  ;;  %v69_v8 = vld [vmem:[#allocation3 + $0x8] sm:$0xff]  ;;  %179 = vmatpush.msra.mxu2 %v159_v6  ;;  %v157_v9 = vld [vmem:[#allocation5 + $0x28] sm:$0xff]  ;;  %271 = vmatpush.msra.mxu3 %v159_v6  ;;  %vm252_vm7 = vcmask 7168  }
  0x10   :  { %261 = vmatpush.msk.msra.mxu0 %vm83_vm1, %v75_v3  ;;  %v73_v5 = vld [vmem:[%s449_s1] sm:$0xff]  ;;  %133 = vmatpush.msra.mxu1 %v71_v2  ;;  %v156_v12 = vld [vmem:[#allocation5 + $0x20] sm:$0xff]  ;;  %v153_v17 = vld [vmem:[#allocation5 + $0x8] sm:$0xff] }
  0x11   :  { %262 = vmatmul.msk.f32.vlgmr.msra.gmra.mxu0 %vm76_vm2, %v73_v5  ;;  %v158_v7 = vld [vmem:[#allocation5 + $0x30] sm:$0xff]  ;;  %v68_v10 = vld [vmem:[#allocation3] sm:$0xff]  ;;  %v152_v18 = vld [vmem:[#allocation5] sm:$0xff] }
  0x12   :  { %134 = vmatpush.msra.mxu1 %v70_v4  ;;  %180 = vmatpush.msra.mxu2 %v158_v7  ;;  %v66_v11 = vld [vmem:[%s448_s0] sm:$0xff]  ;;  %v74_v13 = vld [vmem:[%s449_s1 + $0x8] sm:$0xff] }
  0x13   :  { %272 = vmatpush.msra.mxu3 %v158_v7  ;;  %v67_v14 = vld [vmem:[%s448_s0 + $0x8] sm:$0xff]  ;;  %v154_v16 = vld [vmem:[#allocation5 + $0x10] sm:$0xff] }
  0x14   :  { %135 = vmatpush.msra.mxu1 %v69_v8  ;;  %181 = vmatpush.msra.mxu2 %v157_v9  ;;  %v155_v15 = vld [vmem:[#allocation5 + $0x18] sm:$0xff]  ;;  %v283_v20 = vld [vmem:[%s452_s4] ss:$0 sm:$0xff] }
  0x15   :  { %273 = vmatpush.msra.mxu3 %v157_v9  ;;  %v284_v30 = vld [vmem:[%s454_s6] ss:$0 sm:$0xff] }
  0x16   :  { %136 = vmatpush.msra.mxu1 %v68_v10  ;;  %182 = vmatpush.msra.mxu2 %v156_v12  ;;  %v285_v33 = vld [vmem:[%s455_s7] ss:$0 sm:$0xff] }
  0x17   :  { %265 = vmatmul.msk.f32.vlgmr.msra.gmra.mxu1 %vm110_vm3, %v66_v11  ;;  %274 = vmatpush.msra.mxu3 %v156_v12  ;;  %v286_v42 = vld [vmem:[#allocation2] ss:$0 sm:$0xff] }
  0x18   :  { %183 = vmatpush.msra.mxu2 %v155_v15 }
  0x19   :  { %263 = vmatmul.msk.f32.gmra.mxu0 %vm76_vm2, %v74_v13  ;;  %275 = vmatpush.msra.mxu3 %v155_v15 }
  0x1a   :  { %184 = vmatpush.msra.mxu2 %v154_v16 }
  0x1b   :  { %276 = vmatpush.msra.mxu3 %v154_v16 }
  0x1c   :  { %185 = vmatpush.msra.mxu2 %v153_v17 }
  0x1d   :  { %277 = vmatpush.msra.mxu3 %v153_v17 }
  0x1e   :  { %186 = vmatpush.msra.mxu2 %v152_v18 }
  0x1f   :  { %266 = vmatmul.msk.f32.gmra.mxu1 %vm110_vm3, %v67_v14  ;;  %278 = vmatpush.msra.mxu3 %v152_v18 }
  0x8e   :  { %v104_v19 = vpop.f32.mrf.mxu0 }
  0x94   :  { %v138_v21 = vpop.f32.mrf.mxu1 }
  0x95   :  { %v139_v22 = vadd.f32 %v138_v21, %v104_v19 }
  0x96   :  { %v107_v25 = vpop.f32.mrf.mxu0 }
  0x97   :  { %v148_v23 = vadd.f32 %v283_v20, %v139_v22 }
  0x99   :  { %v150_v24 = vmax.f32 %v148_v23, 0.0 }
  0x9b   :  { %267 = vmatmul.msk.f32.vlgmr.msra.gmra.mxu2 %vm164_vm4, %v150_v24 }
  0x9c   :  { %v141_v26 = vpop.f32.mrf.mxu1 }
  0x9d   :  { %v142_v27 = vadd.f32 %v141_v26, %v107_v25 }
  0x9f   :  { %v149_v28 = vadd.f32 %v283_v20, %v142_v27 }
  0xa1   :  { %v151_v29 = vmax.f32 %v149_v28, 0.0 }
  0xa3   :  { %268 = vmatmul.msk.f32.vlgmr.msra.gmra.mxu3 %vm164_vm4, %v151_v29 }
 0x11e   :  { %v188_v31 = vpop.f32.mrf.mxu2 }
 0x11f   :  { %v189_v32 = vadd.f32 %v284_v30, %v188_v31 }
 0x121   :  { %v194_v34 = vmax.f32 %v189_v32, 0.0 }
 0x123   :  { %v200_v35 = vmul.f32 %v285_v33, %v194_v34 }
 0x125   :  { %v202_v36 = vsel %vm164_vm4, %v200_v35, 0.0 }
 0x126   :  { %v191_v37 = vpop.f32.mrf.mxu3  ;;  %203 = vadd.xlane.f32.xlu0 %v202_v36 }
 0x127   :  { %v192_v38 = vadd.f32 %v284_v30, %v191_v37 }
 0x129   :  { %v195_v39 = vmax.f32 %v192_v38, 0.0 }
 0x12b   :  { %v201_v40 = vmul.f32 %v285_v33, %v195_v39 }
 0x12d   :  { %v205_v41 = vsel %vm164_vm4, %v201_v40, 0.0 }
 0x12e   :  { %206 = vadd.xlane.f32.xlu0 %v205_v41 }
 0x199   :  { %v204_v43 = vpop.xlane.xlu0 %203 }
 0x19a   :  { %v212_v44 = vadd.f32 %v286_v42, %v204_v43 }
 0x19c   :  { %v269_v45 = vmul.f32 -1.442695, %v212_v44 }
 0x19e   :  { %287 = vpow2.f32 %v269_v45 }
 0x1a1   :  { %v207_v46 = vpop.xlane.xlu0 %206 }
 0x1a2   :  { %v213_v47 = vadd.f32 %v286_v42, %v207_v46 }
 0x1a4   :  { %v288_v48 = vpop.eup %287  ;;  %v270_v49 = vmul.f32 -1.442695, %v213_v47 }
 0x1a5   :  { %v220_v50 = vadd.f32 1.0, %v288_v48 }
 0x1a6   :  { %289 = vpow2.f32 %v270_v49 }
 0x1a7   :  { %291 = vrcp.f32 %v220_v50  ;;  %v233_v56 = vand.u32 2147483648, %v220_v50  ;;  %v231_v58 = vand.u32 2147483647, %v220_v50  ;;  %vm227_vm6 = vweird.f32 %v220_v50 }
 0x1a9   :  { %v234_v61 = vor.u32 1.1754944e-38, %v233_v56  ;;  %vm232_vm9 = vcmp.eq.f32.partialorder %v231_v58, 8.507059e+37 }
 0x1ac   :  { %v290_v51 = vpop.eup %289 }
 0x1ad   :  { %v292_v52 = vpop.eup %291  ;;  %v221_v53 = vadd.f32 1.0, %v290_v51 }
 0x1ae   :  { %v223_v54 = vmul.f32 %v292_v52, %v220_v50  ;;  %vm228_vm5 = vweird.f32 %v292_v52 }
 0x1af   :  { %293 = vrcp.f32 %v221_v53  ;;  %vm229_vm8 = vmor %vm227_vm6, %vm228_vm5  ;;  %v248_v2 = vand.u32 2147483648, %v221_v53  ;;  %v246_v4 = vand.u32 2147483647, %v221_v53  ;;  %vm242_vm11 = vweird.f32 %v221_v53 }
 0x1b0   :  { %v224_v55 = vsub.f32 1.0, %v223_v54 }
 0x1b1   :  { %v249_v6 = vor.u32 1.1754944e-38, %v248_v2  ;;  %vm247_vm13 = vcmp.eq.f32.partialorder %v246_v4, 8.507059e+37 }
 0x1b2   :  { %v225_v57 = vmul.f32 %v292_v52, %v224_v55 }
 0x1b4   :  { %v226_v59 = vadd.f32 %v292_v52, %v225_v57 }
 0x1b5   :  { %v294_v60 = vpop.eup %293 }
 0x1b6   :  { %v230_v62 = vsel %vm229_vm8, %v292_v52, %v226_v59  ;;  %v238_v63 = vmul.f32 %v294_v60, %v221_v53  ;;  %vm243_vm10 = vweird.f32 %v294_v60 }
 0x1b7   :  { %v235_v0 = vsel %vm232_vm9, %v234_v61, %v230_v62  ;;  %vm244_vm12 = vmor %vm242_vm11, %vm243_vm10 }
 0x1b8   :  { %253 = vst.msk [vmem:[%s457_s9] sm:$0xff] %vm252_vm7, %v235_v0  ;;  %v239_v1 = vsub.f32 1.0, %v238_v63 }
 0x1ba   :  { %v240_v3 = vmul.f32 %v294_v60, %v239_v1 }
 0x1bc   :  { %v241_v5 = vadd.f32 %v294_v60, %v240_v3 }
 0x1be   :  { %v245_v7 = vsel %vm244_vm12, %v294_v60, %v241_v5 }
 0x1bf   :  { %v250_v8 = vsel %vm247_vm13, %v249_v6, %v245_v7 }
 0x1c0   :  { %254 = vst.msk [vmem:[%s457_s9 + $0x8] sm:$0xff] %vm252_vm7, %v250_v8 }
 0x1c1   :  { %259 = vsyncpa [#allocation4], 1 }
 0x1c2   :  { %260 = vsyncpa [#allocation6], 1 }

</bundles_post_ra>
